<compile_context>
chip_gen: v7x
topology: tpu7x:2x2x1
jax: 0.10.0
libtpu: 0.0.40
codegen_flags: <defaults>
</compile_context>

<pallas_src>
import jax
import jax.numpy as jnp
from jax.experimental import pallas as pl
from jax.experimental.pallas import tpu as pltpu


# ----------------------------- Pallas kernel --------------------------------
def _attention_head_kernel(x_ref, wqkv_ref, wout_ref, o_ref, acc_ref):
    # Grid: (batch, head).  Per step:
    #   x_ref   : (N, dim)           bf16 (batch dim squeezed)
    #   wqkv_ref: (3, dim, d_head)   bf16, this head's q/k/v weights (q pre-scaled)
    #   wout_ref: (d_head, dim)      bf16, this head's slice of the output proj
    #   o_ref   : (N, dim)           output block (original x dtype)
    #   acc_ref : (N, dim)           f32 accumulator scratch (persists across heads)
    h = pl.program_id(1)

    x = x_ref[...]                                                   # (N, dim) bf16

    # Per-head q/k/v projections on the MXU (f32 accumulation).  Softmax scale
    # is already folded into the q weight slab, so no per-element scaling here.
    q = jnp.dot(x, wqkv_ref[0], preferred_element_type=jnp.float32).astype(jnp.bfloat16)
    k = jnp.dot(x, wqkv_ref[1], preferred_element_type=jnp.float32).astype(jnp.bfloat16)
    v = jnp.dot(x, wqkv_ref[2], preferred_element_type=jnp.float32).astype(jnp.bfloat16)

    # q·kᵀ without materializing a transpose: contract the last dim of both.
    dots = jax.lax.dot_general(
        q, k, (((1,), (1,)), ((), ())),
        preferred_element_type=jnp.float32)                          # (N, N) f32

    # Numerically-stable softmax numerator in f32.  Normalization is deferred
    # past the attn@v matmul: scale the (N, d_head) result instead of the
    # (N, N) matrix; the reciprocal goes to the (otherwise idle) EUP slot.
    m = jnp.max(dots, axis=-1, keepdims=True)
    p = jnp.exp(dots - m)                                            # (N, N) f32
    l = jnp.sum(p, axis=-1, keepdims=True)                           # (N, 1) f32

    # dropout(p=0.0) is the identity — nothing to do.
    o_h = jnp.dot(p.astype(jnp.bfloat16), v,
                  preferred_element_type=jnp.float32)                # (N, d) f32
    o_h = o_h * pl.reciprocal(l, approx=True)                        # deferred norm

    # Fused per-head output projection, accumulated across the head grid axis:
    #   out += o_h @ W_out[h*d:(h+1)*d, :]
    contrib = jnp.dot(o_h.astype(jnp.bfloat16), wout_ref[...],
                      preferred_element_type=jnp.float32)            # (N, dim) f32

    @pl.when(h == 0)
    def _():
        acc_ref[...] = jnp.zeros_like(acc_ref)

    acc_ref[...] += contrib

    @pl.when(h == pl.num_programs(1) - 1)
    def _():
        o_ref[...] = acc_ref[...].astype(o_ref.dtype)


# ------------------------------ wrapper --------------------------------------
def attention_forward(x, w_qkv, w_out, *, heads, dim_head):
    """x: (B, N, dim); w_qkv: (3*inner, dim) [torch layout]; w_out: (dim, inner)."""
    B, N, dim = x.shape
    inner_dim = dim * dim_head                  # module quirk: dim * dim_head
    d_head = inner_dim // heads
    scale = float(dim_head) ** -0.5

    # --- one-time weight transforms (outside the hot kernel) ---
    wqkv_t = w_qkv.T                                            # (dim, 3*inner)
    # Fold the softmax scale into the q columns (zero runtime cost).
    q_scale = jnp.concatenate([
        jnp.full((inner_dim,), scale, dtype=wqkv_t.dtype),
        jnp.ones((2 * inner_dim,), dtype=wqkv_t.dtype),
    ])
    wqkv_t = wqkv_t * q_scale[None, :]
    # (dim, 3*inner) -> (heads, 3, dim, d_head): per-head, lane-aligned q/k/v slabs.
    wqkv_h = wqkv_t.reshape(dim, 3, heads, d_head).transpose(2, 1, 0, 3)
    wqkv_h = wqkv_h.astype(jnp.bfloat16)
    # (dim, inner) -> (heads, d_head, dim): per-head slice of the output projection.
    wout_h = w_out.T.reshape(heads, d_head, dim).astype(jnp.bfloat16)
    x_bf16 = x.astype(jnp.bfloat16)

    out_itemsize = jnp.dtype(x.dtype).itemsize

    # --- explicit scoped-VMEM limit, sized from the actual buffers (+2x headroom),
    #     clamped to [32 MiB, 64 MiB] so it is safe on v5e/v6e/v7x alike. ---
    block_bytes = (
        N * dim * 2                 # x block (bf16)
        + 3 * dim * d_head * 2      # per-head wqkv block (bf16)
        + d_head * dim * 2          # per-head wout block (bf16)
        + N * dim * out_itemsize    # output block
    )
    interm_bytes = (
        2 * N * N * 4               # dots + p (f32)
        + 3 * N * d_head * 2        # q, k, v (bf16)
        + 2 * N * dim * 4           # o_h-proj contribution + misc (f32)
    )
    scratch_bytes = N * dim * 4     # f32 accumulator
    vmem_needed = 2 * (2 * block_bytes + interm_bytes + scratch_bytes)
    vmem_limit = int(min(max(vmem_needed, 32 << 20), 64 << 20))

    # --- advisory cost estimate so XLA can overlap surrounding ops ---
    flops = 2 * B * heads * (
        3 * N * dim * d_head        # qkv projection
        + 2 * N * N * d_head        # q·kᵀ and attn·v
        + N * d_head * dim          # output projection
    )
    transcendentals = B * heads * N * N
    bytes_accessed = (
        x_bf16.size * 2 + wqkv_h.size * 2 + wout_h.size * 2
        + B * N * dim * out_itemsize
    )

    return pl.pallas_call(
        _attention_head_kernel,
        out_shape=jax.ShapeDtypeStruct((B, N, dim), x.dtype),
        grid_spec=pltpu.PrefetchScalarGridSpec(
            num_scalar_prefetch=0,
            grid=(B, heads),
            in_specs=[
                # batch dim squeezed: kernel sees 2-D (N, dim); constant across heads
                pl.BlockSpec((None, N, dim), lambda b, h: (b, 0, 0)),
                # per-head weight slabs (head dim squeezed); pipelined across heads
                pl.BlockSpec((None, 3, dim, d_head), lambda b, h: (h, 0, 0, 0)),
                pl.BlockSpec((None, d_head, dim), lambda b, h: (h, 0, 0)),
            ],
            # output block constant across the head axis -> resident accumulator
            out_specs=pl.BlockSpec((None, N, dim), lambda b, h: (b, 0, 0)),
            scratch_shapes=[pltpu.VMEM((N, dim), jnp.float32)],
        ),
        compiler_params=pltpu.CompilerParams(
            dimension_semantics=("parallel", "arbitrary"),
            vmem_limit_bytes=vmem_limit,
        ),
        cost_estimate=pl.CostEstimate(
            flops=flops,
            transcendentals=transcendentals,
            bytes_accessed=bytes_accessed,
        ),
    )(x_bf16, wqkv_h, wout_h)


# ------------------------------ reference ------------------------------------
def attention_reference(x, w_qkv, w_out, *, heads, dim_head):
    B, N, dim = x.shape
    inner_dim = dim * dim_head
    d = inner_dim // heads
    scale = float(dim_head) ** -0.5

    qkv = x @ w_qkv.T                                            # (B, N, 3*inner)
    q, k, v = jnp.split(qkv, 3, axis=-1)

    def to_heads(t):  # 'b n (h d) -> b h n d'
        return t.reshape(B, N, heads, d).transpose(0, 2, 1, 3)

    q, k, v = map(to_heads, (q, k, v))
    dots = jnp.einsum("bhnd,bhmd->bhnm", q, k) * scale
    attn = jax.nn.softmax(dots, axis=-1)
    out = jnp.einsum("bhnm,bhmd->bhnd", attn, v)
    out = out.transpose(0, 2, 1, 3).reshape(B, N, inner_dim)     # 'b h n d -> b n (h d)'
    return out @ w_out.T


# -------------------------------- main ---------------------------------------
if __name__ == "__main__":
    # small shapes consistent with the module
    B, N, dim = 2, 8, 16
    heads, dim_head = 4, 8
    inner_dim = dim * dim_head          # 128 (module quirk: dim * dim_head)

    key = jax.random.PRNGKey(0)
    kx, kq, ko = jax.random.split(key, 3)

    x = jax.random.normal(kx, (B, N, dim), dtype=jnp.float32)
    # deterministic "Linear" weights (torch layout: (out_features, in_features))
    w_qkv = jax.random.normal(kq, (3 * inner_dim, dim), dtype=jnp.float32) * (dim ** -0.5)
    w_out = jax.random.normal(ko, (dim, inner_dim), dtype=jnp.float32) * (inner_dim ** -0.5)

    out = attention_forward(x, w_qkv, w_out, heads=heads, dim_head=dim_head)
    out = jax.block_until_ready(out)

    ref = attention_reference(x, w_qkv, w_out, heads=heads, dim_head=dim_head)
    assert out.shape == (B, N, dim)
    # bf16 MXU inputs + approx reciprocal => compare against the f32 reference
    # with a correspondingly looser tolerance (still catches any structural bug).
    assert jnp.allclose(out, ref, atol=5e-2, rtol=5e-2)

    print("KERNEL_OK")
</pallas_src>

<mosaic_0001>
module attributes {stable_mosaic.version = 11 : i64} {
  func.func @_attention_head_kernel(%arg0: i32, %arg1: i32, %arg2: memref<1x8x16xbf16, #tpu.memory_space<vmem>>, %arg3: memref<1x3x16x32xbf16, #tpu.memory_space<vmem>>, %arg4: memref<1x32x16xbf16, #tpu.memory_space<vmem>>, %arg5: memref<1x8x16xf32, #tpu.memory_space<vmem>>, %arg6: memref<8x16xf32, #tpu.memory_space<vmem>>) attributes {dimension_semantics = [#tpu.dimension_semantics<parallel>, #tpu.dimension_semantics<arbitrary>], iteration_bounds = array<i64: 2, 4>, scalar_prefetch = 0 : i64, scratch_operands = 1 : i64, tpu.core_type = #tpu.core_type<tc>, window_params = [{transform_indices = @transform_0, window_bounds = array<i64: 1, 8, 16>}, {transform_indices = @transform_1, window_bounds = array<i64: 1, 3, 16, 32>}, {transform_indices = @transform_2, window_bounds = array<i64: 1, 32, 16>}, {transform_indices = @transform_3, window_bounds = array<i64: 1, 8, 16>}]} {
    %c0 = arith.constant 0 : index
    %c0_0 = arith.constant 0 : index
    %c0_1 = arith.constant 0 : index
    %0 = vector.load %arg2[%c0, %c0_0, %c0_1] : memref<1x8x16xbf16, #tpu.memory_space<vmem>>, vector<1x8x16xbf16>
    %1 = vector.shape_cast %0 : vector<1x8x16xbf16> to vector<8x16xbf16>
    %c0_2 = arith.constant 0 : index
    %c0_3 = arith.constant 0 : index
    %c0_4 = arith.constant 0 : index
    %c0_5 = arith.constant 0 : index
    %2 = vector.load %arg3[%c0_2, %c0_3, %c0_4, %c0_5] : memref<1x3x16x32xbf16, #tpu.memory_space<vmem>>, vector<1x1x16x32xbf16>
    %3 = vector.shape_cast %2 : vector<1x1x16x32xbf16> to vector<16x32xbf16>
    %cst = arith.constant dense<0.000000e+00> : vector<8x32xf32>
    %4 = tpu.matmul %1, %3, %cst {dimension_numbers = #tpu.dot_dimension_numbers<[1], [0], [0], [1], [0, 0, 1, 1], [], []>} : vector<8x16xbf16>, vector<16x32xbf16>, vector<8x32xf32> -> vector<8x32xf32>
    %5 = arith.truncf %4 : vector<8x32xf32> to vector<8x32xbf16>
    %c0_6 = arith.constant 0 : index
    %c1 = arith.constant 1 : index
    %c0_7 = arith.constant 0 : index
    %c0_8 = arith.constant 0 : index
    %6 = vector.load %arg3[%c0_6, %c1, %c0_7, %c0_8] : memref<1x3x16x32xbf16, #tpu.memory_space<vmem>>, vector<1x1x16x32xbf16>
    %7 = vector.shape_cast %6 : vector<1x1x16x32xbf16> to vector<16x32xbf16>
    %cst_9 = arith.constant dense<0.000000e+00> : vector<8x32xf32>
    %8 = tpu.matmul %1, %7, %cst_9 {dimension_numbers = #tpu.dot_dimension_numbers<[1], [0], [0], [1], [0, 0, 1, 1], [], []>} : vector<8x16xbf16>, vector<16x32xbf16>, vector<8x32xf32> -> vector<8x32xf32>
    %9 = arith.truncf %8 : vector<8x32xf32> to vector<8x32xbf16>
    %c0_10 = arith.constant 0 : index
    %c2 = arith.constant 2 : index
    %c0_11 = arith.constant 0 : index
    %c0_12 = arith.constant 0 : index
    %10 = vector.load %arg3[%c0_10, %c2, %c0_11, %c0_12] : memref<1x3x16x32xbf16, #tpu.memory_space<vmem>>, vector<1x1x16x32xbf16>
    %11 = vector.shape_cast %10 : vector<1x1x16x32xbf16> to vector<16x32xbf16>
    %cst_13 = arith.constant dense<0.000000e+00> : vector<8x32xf32>
    %12 = tpu.matmul %1, %11, %cst_13 {dimension_numbers = #tpu.dot_dimension_numbers<[1], [0], [0], [1], [0, 0, 1, 1], [], []>} : vector<8x16xbf16>, vector<16x32xbf16>, vector<8x32xf32> -> vector<8x32xf32>
    %13 = arith.truncf %12 : vector<8x32xf32> to vector<8x32xbf16>
    %cst_14 = arith.constant dense<0.000000e+00> : vector<8x8xf32>
    %14 = tpu.matmul %5, %9, %cst_14 {dimension_numbers = #tpu.dot_dimension_numbers<[1], [1], [0], [0], [0, 0, 1, 0], [], []>} : vector<8x32xbf16>, vector<8x32xbf16>, vector<8x8xf32> -> vector<8x8xf32>
    %cst_15 = arith.constant dense<0xFF800000> : vector<8xf32>
    %15 = vector.multi_reduction <maximumf>, %14, %cst_15 [1] : vector<8x8xf32> to vector<8xf32>
    %16 = vector.shape_cast %15 : vector<8xf32> to vector<8x1xf32>
    %17 = vector.broadcast %16 : vector<8x1xf32> to vector<8x8xf32>
    %18 = arith.subf %14, %17 : vector<8x8xf32>
    %19 = math.exp %18 : vector<8x8xf32>
    %cst_16 = arith.constant dense<0.000000e+00> : vector<8xf32>
    %20 = vector.multi_reduction <add>, %19, %cst_16 [1] : vector<8x8xf32> to vector<8xf32>
    %21 = vector.shape_cast %20 : vector<8xf32> to vector<8x1xf32>
    %22 = arith.truncf %19 : vector<8x8xf32> to vector<8x8xbf16>
    %cst_17 = arith.constant dense<0.000000e+00> : vector<8x32xf32>
    %23 = tpu.matmul %22, %13, %cst_17 {dimension_numbers = #tpu.dot_dimension_numbers<[1], [0], [0], [1], [0, 0, 1, 1], [], []>} : vector<8x8xbf16>, vector<8x32xbf16>, vector<8x32xf32> -> vector<8x32xf32>
    %24 = tpu.reciprocal %21 {approx = true} : vector<8x1xf32> -> vector<8x1xf32>
    %25 = vector.broadcast %24 : vector<8x1xf32> to vector<8x32xf32>
    %26 = arith.mulf %23, %25 : vector<8x32xf32>
    %27 = arith.truncf %26 : vector<8x32xf32> to vector<8x32xbf16>
    %c0_18 = arith.constant 0 : index
    %c0_19 = arith.constant 0 : index
    %c0_20 = arith.constant 0 : index
    %28 = vector.load %arg4[%c0_18, %c0_19, %c0_20] : memref<1x32x16xbf16, #tpu.memory_space<vmem>>, vector<1x32x16xbf16>
    %29 = vector.shape_cast %28 : vector<1x32x16xbf16> to vector<32x16xbf16>
    %cst_21 = arith.constant dense<0.000000e+00> : vector<8x16xf32>
    %30 = tpu.matmul %27, %29, %cst_21 {dimension_numbers = #tpu.dot_dimension_numbers<[1], [0], [0], [1], [0, 0, 1, 1], [], []>} : vector<8x32xbf16>, vector<32x16xbf16>, vector<8x16xf32> -> vector<8x16xf32>
    %c0_i32 = arith.constant 0 : i32
    %31 = arith.cmpi eq, %arg1, %c0_i32 : i32
    %32 = arith.extui %31 : i1 to i32
    %c0_i32_22 = arith.constant 0 : i32
    %33 = arith.cmpi ne, %32, %c0_i32_22 : i32
    scf.if %33 {
      %cst_28 = arith.constant 0.000000e+00 : f32
      %40 = vector.broadcast %cst_28 : f32 to vector<8x16xf32>
      %c0_29 = arith.constant 0 : index
      %c0_30 = arith.constant 0 : index
      %41 = vector.load %arg6[%c0_29, %c0_30] : memref<8x16xf32, #tpu.memory_space<vmem>>, vector<8x16xf32>
      tpu.vector_store %arg6[%c0_29, %c0_30], %40 {strides = array<i32>} : memref<8x16xf32, #tpu.memory_space<vmem>>, vector<8x16xf32>,
    } else {
    }
    %c0_23 = arith.constant 0 : index
    %c0_24 = arith.constant 0 : index
    %34 = vector.load %arg6[%c0_23, %c0_24] : memref<8x16xf32, #tpu.memory_space<vmem>>, vector<8x16xf32>
    %35 = arith.addf %34, %30 : vector<8x16xf32>
    %c0_25 = arith.constant 0 : index
    %c0_26 = arith.constant 0 : index
    %36 = vector.load %arg6[%c0_25, %c0_26] : memref<8x16xf32, #tpu.memory_space<vmem>>, vector<8x16xf32>
    tpu.vector_store %arg6[%c0_25, %c0_26], %35 {strides = array<i32>} : memref<8x16xf32, #tpu.memory_space<vmem>>, vector<8x16xf32>,
    %c3_i32 = arith.constant 3 : i32
    %37 = arith.cmpi eq, %arg1, %c3_i32 : i32
    %38 = arith.extui %37 : i1 to i32
    %c0_i32_27 = arith.constant 0 : i32
    %39 = arith.cmpi ne, %38, %c0_i32_27 : i32
    scf.if %39 {
      %c0_28 = arith.constant 0 : index
      %c0_29 = arith.constant 0 : index
      %40 = vector.load %arg6[%c0_28, %c0_29] : memref<8x16xf32, #tpu.memory_space<vmem>>, vector<8x16xf32>
      %c0_30 = arith.constant 0 : index
      %c0_31 = arith.constant 0 : index
      %c0_32 = arith.constant 0 : index
      %41 = vector.load %arg5[%c0_30, %c0_31, %c0_32] : memref<1x8x16xf32, #tpu.memory_space<vmem>>, vector<1x8x16xf32>
      %42 = vector.shape_cast %41 : vector<1x8x16xf32> to vector<8x16xf32>
      %43 = vector.shape_cast %40 : vector<8x16xf32> to vector<1x8x16xf32>
      tpu.vector_store %arg5[%c0_30, %c0_31, %c0_32], %43 {strides = array<i32>} : memref<1x8x16xf32, #tpu.memory_space<vmem>>, vector<1x8x16xf32>,
    } else {
    }
    return
  }
  func.func @transform_0(%arg0: i32, %arg1: i32) -> (i32, i32, i32) {
    %c0_i32 = arith.constant 0 : i32
    %c0_i32_0 = arith.constant 0 : i32
    %c0_i32_1 = arith.constant 0 : i32
    return %arg0, %c0_i32, %c0_i32_0 : i32, i32, i32
  }
  func.func @transform_1(%arg0: i32, %arg1: i32) -> (i32, i32, i32, i32) {
    %c0_i32 = arith.constant 0 : i32
    %c0_i32_0 = arith.constant 0 : i32
    %c0_i32_1 = arith.constant 0 : i32
    %c0_i32_2 = arith.constant 0 : i32
    return %arg1, %c0_i32, %c0_i32_0, %c0_i32_1 : i32, i32, i32, i32
  }
  func.func @transform_2(%arg0: i32, %arg1: i32) -> (i32, i32, i32) {
    %c0_i32 = arith.constant 0 : i32
    %c0_i32_0 = arith.constant 0 : i32
    %c0_i32_1 = arith.constant 0 : i32
    return %arg1, %c0_i32, %c0_i32_0 : i32, i32, i32
  }
  func.func @transform_3(%arg0: i32, %arg1: i32) -> (i32, i32, i32) {
    %c0_i32 = arith.constant 0 : i32
    %c0_i32_0 = arith.constant 0 : i32
    %c0_i32_1 = arith.constant 0 : i32
    return %arg0, %c0_i32, %c0_i32_0 : i32, i32, i32
  }
}

</mosaic_0001>

<bundles_post_ra>
// kernel: tpu_custom_call.1
= control target key start
LH: loop header
LB: loop body
LE: loop exit
PB: predicated region body
PF: predicated region fallthrough
CT: control target
= control target key end

     0   :  { %8 = vsyncpa [#allocation4], 0  ;;  %s1256_s0 = inlined_call_operand.hbm [shape: bf16[2,8,16], index: 0, kind: input, shape index: {}]   ;;  %s1257_s1 = inlined_call_operand.vmem [shape: bf16[4,3,16,32], index: 1, kind: input, shape index: {}]   ;;  %s1258_s2 = inlined_call_operand.vmem [shape: bf16[4,32,16], index: 2, kind: input, shape index: {}]   ;;  %s1259_s3 = inlined_call_operand.hbm [shape: f32[2,8,16], index: 3, kind: output, shape index: {}]  }
   0x1   :  { %10 = vsyncpa [#allocation4 + $0x1], 0 }
   0x2   :  { %11 = vsyncpa [#allocation5], 0 }
   0x3   :  { %13 = vsyncpa [#allocation5 + $0x1], 0  ;;  %s1024_s12 = smov 0   ;;  %s1026_s13 = smov 0  }
   0x4   :  { %s1028_s14 = smov 0   ;;  %s1030_s15 = smov 0  }
   0x5   :  { %s1032_s16 = smov 0   ;;  %s1034_s17 = smov 0  }
   0x6   :  { %s1036_s18 = smov 0   ;;  %s1038_s19 = smov 0  }
   0x7 LB: > { %s693_s20 = sadd.s32 4294967295, %s997_s19   ;;  %s694_s21 = sadd.s32 4294967294, %s997_s19   ;;  %s997_s19 = sphi %s1038_s19, %s19_s19   ;;  %s993_s18 = sphi %s1036_s18, %s1276_s18   ;;  %s989_s17 = sphi %s1034_s17, %s1275_s17   ;;  %s985_s16 = sphi %s1032_s16, %s1274_s16   ;;  %s981_s15 = sphi %s1030_s15, %s1273_s15   ;;  %s977_s14 = sphi %s1028_s14, %s1272_s14   ;;  %s973_s13 = sphi %s1026_s13, %s1271_s13   ;;  %s969_s12 = sphi %s1024_s12, %s1270_s12  }
   0x8   : > { %s28_s22 = sadd.s32 1, %s989_s17  ;;  %s31_s23 = sadd.s32 1, %s993_s18 }
   0x9   : > { %p29_p0 = scmp.ge.s32.totalorder %s28_s22, 4  ;;  %s38_s24 = sadd.s32 1, %s977_s14 }
   0xa   : > { %p45_p1 = scmp.ne.s32.totalorder %s977_s14, %s973_s13  ;;  %p46_p2 = scmp.eq.s32.totalorder %s997_s19, 0 }
   0xb   : > { %s1278_s22 = smov (%p29_p0, %s28_s22), 0  ;;  %s1280_s23 = smov (!%p29_p0, %s31_s23), %s993_s18 }
   0xc   : > { %p1075_p3 = por %p46_p2, %p45_p1  ;;  %p51_p4 = scmp.ne.s32.totalorder %s973_s13, %s969_s12 }
   0xd   : > { %p33_p5 = scmp.ge.s32.totalorder %s1280_s23, 2  ;;  %p52_p6 = scmp.eq.s32.totalorder %s693_s20, 0 }
   0xe   : > { %p127_p7 = scmp.eq.s32.totalorder %s693_s20, 7  ;;  %p133_p8 = scmp.eq.s32.totalorder %s694_s21, 7 }
   0xf   : > { %s1282_s23 = smov (%p33_p5, %s1280_s23), 0  ;;  %p1083_p9 = por %p52_p6, %p51_p4 }
  0x10   : > { %p1087_p10 = por %p127_p7, %p45_p1  ;;  %s35_s28 = ssub.s32 %s993_s18, %s1282_s23 }
  0x11   : > { %p1093_p11 = por %p133_p8, %p51_p4  ;;  %p36_p12 = scmp.eq.s32.totalorder %s35_s28, 0 }
  0x12   : > { %s1263_s27 = scalar_select %p1087_p10, 1, 0 }
  0x13   : > { %s1264_s29 = scalar_select %p1093_p11, 1, 0 }
  0x14   : > { %p791_p13 = scmp.lt.s32.totalorder %s997_s19, 8  ;;  %s153_s30 = sand.u32 1, %s977_s14  }
  0x15   : > { %s1100_s4 = scalar_select %p36_p12, %s977_s14, %s38_s24  }
  0x16   : > { %s697_s5 = sshll.u32 %s153_s30, 2  ;;  %s698_s6 = sshll.u32 %s993_s18, 6 }
  0x17   : > { %s1106_s9 = scalar_lea.hbm %s1256_s0, %s698_s6  ;;  %s157_s10 = scalar_lea.vmem [#allocation3], %s697_s5 }
  0x18   : > { %s164_s11 = sshll.u32 %s157_s10, 4  ;;  %p1112_p0 = pnand %p791_p13, %p1075_p3  ;;  %s1108_s11 = int_to_ptr.vmem [resolvable:$true] %s164_s11 }
  0x19   : > { %s154_s21 = scalar_lea.sflag [#allocation4], %s153_s30  ;;  %s869_s24 = scalar_lea.hbm %s1106_s9, 64 }
  0x1a   : > { %p870_p4 = scmp.ne.s32.totalorder %s1106_s9, %s869_s24  ;;  %p871_p5 = pneg %p1112_p0 }
  0x1b   : > { %s874_s25 = scalar_lea.hbm %s1256_s0, 128  ;;  %p875_p3 = scmp.lt.u32.totalorder %s1106_s9, %s1256_s0 }
  0x1c   : > { %p872_p6 = pnand %p871_p5, %p870_p4  ;;  %p876_p8 = scmp.lt.u32.totalorder %s874_s25, %s869_s24 }
  0x1d   : > { %p878_p13 = scmp.lt.u32.totalorder %s869_s24, %s1106_s9 }
  0x1e   : > { %p873_p7 = pneg %p872_p6  ;;  %p877_p12 = por %p876_p8, %p875_p3 }
  0x20   : > { %p879_p1 = por %p878_p13, %p877_p12 }
  0x22   : > { %p880_p2 = pnand %p879_p1, %p873_p7 }
  0x24   : > { %883 = shalt.err (!%p880_p2)
}
  0x25   : > { %s884_s30 = scalar_lea.vmem %s1108_s11, 64  ;;  %s999_s8 = smov [#allocation3]  }
  0x26   : > { %p885_p4 = scmp.ne.s32.totalorder %s1108_s11, %s884_s30  ;;  %s889_s10 = sshll.u32 %s999_s8, 4  ;;  %s890_s10 = int_to_ptr.vmem [resolvable:$false] %s889_s10 }
  0x27   : > { %s891_s28 = scalar_lea.vmem %s890_s10, 128  ;;  %p892_p10 = scmp.lt.s32.totalorder %s1108_s11, %s890_s10 }
  0x28   : > { %p887_p6 = pnand %p885_p4, %p871_p5  ;;  %p893_p3 = scmp.lt.s32.totalorder %s891_s28, %s884_s30 }
  0x2a   : > { %p888_p11 = pneg %p887_p6  ;;  %p894_p8 = por %p893_p3, %p892_p10 }
  0x2c   : > { %p895_p12 = pnand %p894_p8, %p888_p11 }
  0x2e   : > { %898 = shalt.err (!%p895_p12)
}
  0x2f   : > { %786 = dma.hbm_to_vmem [thread:$0]  (!%p1112_p0), %s1106_s9, 64, %s1108_s11, %s154_s21  }
  0x30   : > { %p1266_p1 = scmp.lt.s32.totalorder %s997_s19, 9  ;;  %p1267_p2 = scmp.ge.s32.totalorder %s997_s19, 1 }
  0x32   : > { %p186_p5 = pnand %p1267_p2, %p1266_p1 }
  0x33   : > { %s1148_s24 = sand.u32 (!%p186_p5), 1, %s973_s13  }
  0x34   : > { %189 = sbr.rel (%p186_p5) target bundleno = 1133 (0x46d), region = 32  ;;  %s700_s5 = sshll.u32 (!%p186_p5), %s1148_s24, 2 }
  0x35   : > { %s192_s25 = scalar_lea.sflag (!%p186_p5), [#allocation4], %s1148_s24  ;;  %s195_s6 = scalar_lea.vmem (!%p186_p5), [#allocation3], %s700_s5 }
  0x3b   : > { %960 = dma.done.wait (%p1083_p9), %s192_s25, 64  }
  0x3c   : > { %962 = vsyncadd (%p1083_p9), %s192_s25, 4294967232  ;;  %p228_p10 = scmp.lt.s32.totalorder %s981_s15, 3  ;;  %s701_s9 = sshll.u32 %s1148_s24, 3  ;;  %v1000_v0 = vmov 0.0   ;;  %vm1001_vm0 = vmmov 0   ;;  %vm248_vm1 = vcmask 130048  }
  0x3d   : > { %746 = vmatprep.subr.bf16.mxu1 %v1000_v0  ;;  %748 = vmatprep.mubr.msk.bf16.mxu1 %vm1001_vm0, %v1000_v0  ;;  %v239_v2 = vld [vmem:[%s195_s6] sm:$0xf]  ;;  %vm393_vm2 = vcmask 261120   ;;  %vm440_vm3 = vcmask 64512   ;;  %vm454_vm4 = vcmask 1043456   ;;  %s227_s5 = scalar_lea.vmem [#allocation6], %s701_s9 }
  0x3e   : > { %s1162_s11 = scalar_select %p228_p10, %s981_s15, 3  ;;  %740 = vmatprep.subr.bf16.mxu0 %v1000_v0  ;;  %742 = vmatprep.mubr.msk.bf16.mxu0 %vm1001_vm0, %v1000_v0 }
  0x3f   : > { %p720_p9 = scmp.ne.s32.totalorder %s981_s15, 0 }
  0x40   : > { %s778_s26 = smul.u32 24, %s1162_s11  ;;  %s726_s30 = sshll.u32 %s1162_s11, 4  ;;  %v1002_v47 = vmov (!%p720_p9), 0.0  }
  0x41   : > { %s237_s28 = scalar_lea.vmem %s1258_s2, %s726_s30  ;;  %564 = vst.msk [vmem:[#allocation2] sm:$0xff] (!%p720_p9), %vm248_vm1, %v1002_v47 }
  0x42   : > { %s232_s7 = scalar_lea.vmem %s1257_s1, %s778_s26  ;;  %v863_v33 = vld [vmem:[%s237_s28] sm:$0xff]   ;;  %v864_v34 = vld [vmem:[%s237_s28 + $0x8] sm:$0xff]  }
  0x43   : > { %v860_v1 = vld [vmem:[%s232_s7 + $0x8] sm:$0xff]   ;;  %v861_v3 = vld [vmem:[%s232_s7] sm:$0xff]   ;;  %v862_v4 = vld [vmem:[%s232_s7 + $0x10] sm:$0xff]  }
  0x44   : > { %747 = vmatpush3.bf16.msra.mxu1 %v860_v1  ;;  %741 = vmatpush3.bf16.msra.mxu0 %v861_v3 }
  0x45   : > { %758 = vmatprep.subr.bf16.mxu1 %v1000_v0  ;;  %752 = vmatprep.subr.bf16.mxu0 %v1000_v0 }
  0x47   : > { %749 = vmatmul.mubr.msk.bf16.vlgmr.msra.gmra.mrb[0].mxu1 %vm248_vm1, %v239_v2  ;;  %743 = vmatmul.mubr.msk.bf16.vlgmr.msra.gmra.mrb[0].mxu0 %vm248_vm1, %v239_v2 }
  0x48   : > { %760 = vmatprep.mubr.msk.bf16.mxu1 %vm1001_vm0, %v1000_v0  ;;  %754 = vmatprep.mubr.msk.bf16.mxu0 %vm1001_vm0, %v1000_v0 }
  0x49   : > { %753 = vmatpush3.bf16.msra.mxu0 %v862_v4 }
  0x4a   : > { %764 = vmatprep.subr.bf16.mxu0 %v1000_v0 }
  0x4f   : > { %755 = vmatmul.mubr.msk.bf16.vlgmr.msra.gmra.mrb[4].mxu0 %vm248_vm1, %v239_v2 }
  0x50   : > { %766 = vmatprep.mubr.msk.bf16.mxu0 %vm1001_vm0, %v1000_v0 }
 0x11a   : > { %v336_v5 = vpop.f32.mrb[0].mxu1  ;;  %v286_v9 = vpop.f32.mrb[0].mxu0 }
 0x11b   : > { %v342_v6 = vpack.c.bf16 %v336_v5, %v336_v5  ;;  %v750_v7 = vpop.f32.mrb[1].mxu1  ;;  %v744_v12 = vpop.f32.mrb[1].mxu0  ;;  %v292_v15 = vpack.c.bf16 %v286_v9, %v286_v9 }
 0x11c   : > { %v339_v8 = vpop.f32.mrb[2].mxu1  ;;  %v289_v13 = vpop.f32.mrb[2].mxu0 }
 0x11d   : > { %v398_v10 = vsel %vm393_vm2, %v342_v6, 0  ;;  %v751_v11 = vpop.f32.mrb[3].mxu1  ;;  %v745_v14 = vpop.f32.mrb[3].mxu0 }
 0x11e   : > { %759 = vmatpush3.bf16.xpose.msra.mxu1 %v398_v10 }
 0x11f   : > { %770 = vmatprep.subr.bf16.mxu1 %v1000_v0 }
 0x122   : > { %v386_v21 = vpop.f32.mrb[4].mxu0 }
 0x123   : > { %v392_v22 = vpack.c.bf16 %v386_v21, %v386_v21  ;;  %v756_v23 = vpop.f32.mrb[5].mxu0 }
 0x124   : > { %v389_v24 = vpop.f32.mrb[6].mxu0 }
 0x125   : > { %761 = vmatmul.mubr.msk.bf16.vlgmr.msra.gmra.mrb[4].mxu1 %vm393_vm2, %v292_v15  ;;  %v456_v25 = vsel %vm454_vm4, %v392_v22, 0  ;;  %v757_v26 = vpop.f32.mrb[7].mxu0 }
 0x126   : > { %774 = vmatprep.mubr.msk.bf16.mxu1 %vm1001_vm0, %v1000_v0  ;;  %765 = vmatpush3.bf16.msra.mxu0 %v456_v25 }
 0x127   : > { %771 = vmatpush3.bf16.msra.mxu1 %v863_v33 }
 0x128   : > { %772 = vmatprep.subr.bf16.mxu1 %v1000_v0 }
 0x12b   : > { %773 = vmatpush3.bf16.msra.mxu1 %v864_v34 }
 0x1f8   : > { %v434_v16 = vpop.f32.mrb[4].mxu1 }
 0x1f9   : > { %v762_v17 = vpop.f32.mrb[5].mxu1  ;;  %v441_v18 = vsel %vm440_vm3, %v434_v16, -inf }
 0x1fa   : > { %442 = vmax.xlane.f32.xlu0 %v441_v18  ;;  %v437_v19 = vpop.f32.mrb[6].mxu1 }
 0x1fb   : > { %v763_v20 = vpop.f32.mrb[7].mxu1 }
 0x287   : > { %v443_v27 = vpop.xlane.xlu0 %442 }
 0x288   : > { %v444_v28 = vsub.f32 %v434_v16, %v443_v27 }
 0x28a   : > { %v445_v29 = vmul.f32 1.442695, %v444_v28 }
 0x28c   : > { %865 = vpow2.f32 %v445_v29 }
 0x296   : > { %v866_v30 = vpop.eup %865 }
 0x297   : > { %v447_v31 = vsel %vm440_vm3, %v866_v30, 0.0  ;;  %v450_v32 = vpack.c.bf16 %v866_v30, %v866_v30 }
 0x298   : > { %448 = vadd.xlane.f32.xlu0 %v447_v31 }
 0x299   : > { %767 = vmatmul.mubr.msk.bf16.vlgmr.msra.gmra.mrb[8].mxu0 %vm440_vm3, %v450_v32 }
 0x325   : > { %v449_v35 = vpop.xlane.xlu0 %448 }
 0x326   : > { %867 = vrcp.f32 %v449_v35 }
 0x330   : > { %v868_v36 = vpop.eup %867 }
 0x36c   : > { %v492_v37 = vpop.f32.mrb[8].mxu0 }
 0x36d   : > { %v499_v38 = vmul.f32 %v868_v36, %v492_v37  ;;  %v768_v39 = vpop.f32.mrb[9].mxu0 }
 0x36e   : > { %v495_v40 = vpop.f32.mrb[10].mxu0 }
 0x36f   : > { %v500_v41 = vpack.c.bf16 %v499_v38, %v499_v38  ;;  %v769_v42 = vpop.f32.mrb[11].mxu0 }
 0x371   : > { %775 = vmatmul.mubr.msk.bf16.vlgmr.msra.gmra.mrb[8].mxu1 %vm393_vm2, %v500_v41 }
 0x441   : > { %563 = sbr.rel (%p720_p9) target bundleno = 1096 (0x448), region = 40 }
 0x444   : > { %v554_v43 = vpop.f32.mrb[8].mxu1 }
 0x445   : > { %v776_v44 = vpop.f32.mrb[9].mxu1 }
 0x446   : > { %v557_v45 = vpop.f32.mrb[10].mxu1 }
 0x447   : > { %v777_v46 = vpop.f32.mrb[11].mxu1 }
 0x448 PF: > { %v565_v48 = vld [vmem:[#allocation2] sm:$0xff]  ;;  %p721_p11 = scmp.ne.s32.totalorder %s981_s15, 3 }
 0x449   : > { %v566_v49 = vadd.f32 %v565_v48, %v554_v43 }
 0x44a   : > { %571 = sbr.rel (%p721_p11) target bundleno = 1108 (0x454), region = 44 }
 0x44b   : > { %567 = vst.msk [vmem:[#allocation2] sm:$0xff] %vm248_vm1, %v566_v49 }
 0x452   : > { %v572_v50 = vld [vmem:[#allocation2] sm:$0xff] }
 0x453   : > { %573 = vst.msk [vmem:[%s227_s5] sm:$0xff] %vm248_vm1, %v572_v50 }
 0x454 PF: > { %s723_s25 = sshll.u32 %s985_s16, 7  ;;  %s588_s26 = sshll.u32 %s227_s5, 4  ;;  %s589_s26 = int_to_ptr.vmem [resolvable:$true] %s588_s26 }
 0x455   : > { %s1208_s11 = scalar_lea.hbm %s1259_s3, %s723_s25  ;;  %s575_s20 = scalar_lea.sflag [#allocation5], %s1148_s24 }
 0x456   : > { %s899_s21 = scalar_lea.vmem %s589_s26, 128  ;;  %p1268_p7 = scmp.ne.s32.totalorder %s1263_s27, 0 }
 0x457   : > { %p900_p0 = scmp.ne.s32.totalorder %s589_s26, %s899_s21  ;;  %s1003_s15 = smov [#allocation6]  }
 0x458   : > { %s903_s7 = sshll.u32 %s1003_s15, 4  ;;  %s904_s7 = int_to_ptr.vmem [resolvable:$false] %s903_s7 }
 0x459   : > { %p901_p13 = pnand %p900_p0, %p1268_p7  ;;  %s905_s30 = scalar_lea.vmem %s904_s7, 256 }
 0x45a   : > { %p906_p6 = scmp.lt.s32.totalorder %s589_s26, %s904_s7  ;;  %p907_p3 = scmp.lt.s32.totalorder %s905_s30, %s899_s21 }
 0x45b   : > { %p902_p4 = pneg %p901_p13 }
 0x45c   : > { %p908_p8 = por %p907_p3, %p906_p6 }
 0x45e   : > { %p909_p12 = pnand %p908_p8, %p902_p4 }
 0x460   : > { %912 = shalt.err (!%p909_p12)
}
 0x461   : > { %s913_s16 = scalar_lea.hbm %s1208_s11, 128  ;;  %s917_s10 = scalar_lea.hbm %s1259_s3, 256 }
 0x462   : > { %p914_p1 = scmp.ne.s32.totalorder %s1208_s11, %s913_s16  ;;  %p918_p10 = scmp.lt.u32.totalorder %s1208_s11, %s1259_s3 }
 0x463   : > { %p919_p9 = scmp.lt.u32.totalorder %s917_s10, %s913_s16  ;;  %p921_p0 = scmp.lt.u32.totalorder %s913_s16, %s1208_s11 }
 0x464   : > { %p915_p2 = pnand %p914_p1, %p1268_p7 }
 0x465   : > { %p920_p11 = por %p919_p9, %p918_p10 }
 0x466   : > { %p916_p5 = pneg %p915_p2 }
 0x467   : > { %p922_p13 = por %p921_p0, %p920_p11 }
 0x469   : > { %p923_p4 = pnand %p922_p13, %p916_p5 }
 0x46b   : > { %926 = shalt.err (!%p923_p4)
}
 0x46c   : > { %781 = dma.vmem_to_hbm [thread:$0]  (%p1268_p7), %s589_s26, 128, %s1208_s11, %s575_s20  }
 0x46d PF: > { %p792_p6 = scmp.ge.s32.totalorder %s997_s19, 2  ;;  %s600_s25 = sand.u32 1, %s969_s12  }
 0x46e   : > { %p1269_p3 = scmp.ne.s32.totalorder %s1264_s29, 0  ;;  %s601_s6 = scalar_lea.sflag [#allocation5], %s600_s25 }
 0x470   : > { %p788_p8 = pnand %p792_p6, %p1269_p3 }
 0x472   : > { %964 = dma.done.wait (!%p788_p8), %s601_s6, 128  }
 0x473   : > { %966 = vsyncadd (!%p788_p8), %s601_s6, 4294967168  ;;  %s19_s19 = sadd.s32 1, %s997_s19   ;;  %s1270_s12 = smov %s973_s13 }
 0x474   : > { %p16_p12 = scmp.ge.s32.totalorder %s19_s19, 10   ;;  %s1271_s13 = smov %s977_s14 }
 0x475   : > { %s1272_s14 = smov %s1100_s4  ;;  %s1273_s15 = smov %s989_s17 }
 0x476   : > { %s1274_s16 = smov %s993_s18  ;;  %s1275_s17 = smov %s1278_s22 }
 0x477   : > { %s1276_s18 = smov %s1282_s23  ;;  %18 = sbr.rel (!%p16_p12) target bundleno = 7 (0x7), region = 93 }
 0x47e   :  { %606 = vsyncpa [#allocation4], 1 }
 0x47f   :  { %608 = vsyncpa [#allocation4 + $0x1], 1 }
 0x480   :  { %609 = vsyncpa [#allocation5], 1 }
 0x481   :  { %611 = vsyncpa [#allocation5 + $0x1], 1 }

</bundles_post_ra>
